<compile_context>
chip_gen: v7x
topology: tpu7x:2x2x1
jax: 0.10.0
libtpu: 0.0.40
codegen_flags: <defaults>
</compile_context>

<pallas_src>
import functools

import jax
import jax.numpy as jnp
from jax.experimental import pallas as pl
from jax.experimental.pallas import tpu as pltpu


def _round_up(x, m):
    return ((x + m - 1) // m) * m


def _cdiv(a, b):
    return -(-a // b)


# ---------------------------------------------------------------------------
# Fused path: rel streamed in native layout, per-chunk (128,128) transpose.
# ---------------------------------------------------------------------------
def _ote_fused_kernel(num_elem, group, chunks_per_block, x_ref, rel_ref, o_ref):
    """Per chunk of 128 groups (= 128*group batch elements):

    rel_ref block: (rows=groups, 128) native layout, col = E^2*bw + E*e + j
    x_ref   block: (chunks, G*E, 128)  row = E*bw + e, lane = group
    o_ref   block: (chunks, G*E, 128)  row = E*bw + j, lane = group
    """
    E, G = num_elem, group
    EE = E * E
    f32 = jnp.float32

    @pl.loop(0, chunks_per_block)
    def _(c):
        r0 = pl.multiple_of(c * 128, 128)
        # One contiguous, lane-dense (128,128) f32 tile of rel; the XLU
        # transpose puts the 128 groups of this chunk on the lane axis.
        rel_c = rel_ref[pl.ds(r0, 128), :].astype(f32)          # (128, 128)
        rel_t = jnp.transpose(rel_c, (1, 0))                    # (128, 128)
        x_c = x_ref[c].astype(f32)                               # (G*E, 128)

        # Pure-VPU contraction: G groups x E terms of sublane-broadcast
        # multiply-adds on (E, 128) slabs.  ~45 live vregs -> no spills.
        slabs = []
        for bw in range(G):
            acc = x_c[E * bw:E * bw + 1, :] * rel_t[EE * bw:EE * bw + E, :]
            for e in range(1, E):
                acc = acc + (x_c[E * bw + e:E * bw + e + 1, :] *
                             rel_t[EE * bw + E * e:EE * bw + E * e + E, :])
            slabs.append(acc)                                    # (E, 128)
        o_ref[c] = jnp.concatenate(slabs, axis=0).astype(o_ref.dtype)


# ---------------------------------------------------------------------------
# Fallback path: lane-dense batch-last layout produced by wrapper transposes.
# ---------------------------------------------------------------------------
def _ote_fallback_kernel(num_elem, x_ref, rel_ref, o_ref):
    """out[j, :] = sum_e x[e, :] * rel[e*E + j, :] (per-slab ref loads)."""
    E = num_elem
    f32 = jnp.float32
    acc = x_ref[0:1, :].astype(f32) * rel_ref[0:E, :].astype(f32)
    for e in range(1, E):
        acc = acc + (x_ref[e:e + 1, :].astype(f32) *
                     rel_ref[e * E:(e + 1) * E, :].astype(f32))
    o_ref[...] = acc.astype(o_ref.dtype)


def ote_forward(inputs, inputs_rel, num_elem, scale_type=0,
                tile_rows=4096, tile_lanes=32768, relayout_in_kernel=None):
    """Pallas implementation of OTE.forward (scale_type=0)."""
    if scale_type:
        # TODO(synk): scale_type > 0 path (abs/exp scale column) not implemented.
        raise NotImplementedError("only scale_type=0 is supported")

    E = int(num_elem)
    EE = E * E
    inputs_size = inputs.shape
    assert inputs_size[:-1] == inputs_rel.shape[:-1]
    assert inputs.shape[-1] % E == 0
    assert inputs_rel.shape[-1] == inputs.shape[-1] * E

    B = inputs.size // E                      # flattened bmm batch
    itemsize = jnp.dtype(inputs.dtype).itemsize
    x2d = inputs.reshape(-1, E)

    cost = pl.CostEstimate(flops=2 * EE * B, transcendentals=0,
                           bytes_accessed=(EE + 2 * E) * B * itemsize)
    cparams = pltpu.CompilerParams(
        dimension_semantics=("parallel",),       # shards grid across v7x TCs
        vmem_limit_bytes=32 * 1024 * 1024)       # raises v5e's 16 MiB default

    fuse_ok = (128 % EE == 0) and (B % (128 // EE) == 0)
    use_fused = fuse_ok and (relayout_in_kernel is not False)

    if use_fused:
        G = 128 // EE                         # batch elements per 128-lane row
        n_groups = B // G                     # rows of the native rel view

        # Tile (in rel rows).  Cap so the grid has >= ~4 steps when possible
        # (v7x megacore + pipeline overlap), and keep it a multiple of 128 so
        # every in-kernel chunk transpose is exactly (128, 128).
        tr = _round_up(max(128, min(int(tile_rows), 8192)), 128)
        tr = min(tr, max(128, _round_up(_cdiv(n_groups, 4), 128)))
        nsteps = _cdiv(n_groups, tr)
        n_groups_pad = nsteps * tr
        n_chunks = n_groups_pad // 128
        trc = tr // 128

        # rel: ZERO-COST reshape -> (n_groups, 128); no wrapper copy of the
        # dominant stream.  Pad rows only when a single small block would be
        # larger than the array (tiny inputs), otherwise rely on the masked
        # partial last grid block.
        rel_g = inputs_rel.reshape(n_groups, 128)
        if n_groups < tr:
            rel_g = jnp.pad(rel_g, ((0, n_groups_pad - n_groups), (0, 0)))

        # x / out relayout: small streams (E x smaller than rel).
        # TODO(synk): these could also stay native with in-kernel minor
        # transposes, saving a further ~2E*B*itemsize of HBM traffic.
        x3 = x2d.reshape(n_groups, G, E)
        if n_groups_pad > n_groups:
            x3 = jnp.pad(x3, ((0, n_groups_pad - n_groups), (0, 0), (0, 0)))
        x_g = (x3.reshape(n_chunks, 128, G, E)
                 .transpose(0, 2, 3, 1)
                 .reshape(n_chunks, G * E, 128))

        out_g = pl.pallas_call(
            functools.partial(_ote_fused_kernel, E, G, trc),
            out_shape=jax.ShapeDtypeStruct((n_chunks, G * E, 128),
                                           inputs.dtype),
            grid=(nsteps,),
            in_specs=[
                pl.BlockSpec((trc, G * E, 128), lambda i: (i, 0, 0)),
                pl.BlockSpec((tr, 128), lambda i: (i, 0)),
            ],
            out_specs=pl.BlockSpec((trc, G * E, 128), lambda i: (i, 0, 0)),
            compiler_params=cparams,
            cost_estimate=cost,
        )(x_g, rel_g)

        out2d = (out_g.reshape(n_chunks, G, E, 128)
                      .transpose(0, 3, 1, 2)
                      .reshape(n_groups_pad * G, E))[:B]
        return out2d.reshape(inputs_size)

    # ------------------- fallback: wrapper-side relayout --------------------
    x_t = x2d.T                                   # (E, B)
    rel_t = inputs_rel.reshape(-1, EE).T          # (E*E, B)

    # Large lane tile, bounded so two double-buffered input blocks plus the
    # output stay well under the scoped VMEM limit for any E.
    per_lane = (EE + 2 * _round_up(E, 8)) * itemsize
    tb_cap = max(128, ((12 * 1024 * 1024) // (2 * per_lane)) // 128 * 128)
    tb = _round_up(max(128, min(int(tile_lanes), 65536, tb_cap)), 128)
    tb = min(tb, max(128, _round_up(_cdiv(B, 4), 128)))  # >= ~4 grid steps
    if B <= 128:
        tb = B                                    # single full-extent block
    grid = (_cdiv(B, tb),)

    out_t = pl.pallas_call(
        functools.partial(_ote_fallback_kernel, E),
        out_shape=jax.ShapeDtypeStruct((E, B), inputs.dtype),
        grid=grid,
        in_specs=[pl.BlockSpec((E, tb), lambda i: (0, i)),
                  pl.BlockSpec((EE, tb), lambda i: (0, i))],
        out_specs=pl.BlockSpec((E, tb), lambda i: (0, i)),
        compiler_params=cparams,
        cost_estimate=cost,
    )(x_t, rel_t)
    return out_t.T.reshape(inputs_size)


if __name__ == "__main__":
    def reference(inputs, inputs_rel, E):
        x = inputs.reshape(-1, E)
        r = inputs_rel.reshape(-1, E, E)
        return jnp.einsum("be,bej->bj", x, r).reshape(inputs.shape)

    def check(inputs, inputs_rel, E):
        fwd = jax.jit(functools.partial(ote_forward, num_elem=E))
        try:
            out = jax.block_until_ready(fwd(inputs, inputs_rel))
        except Exception:
            # Toolchain without in-kernel transpose lowering: lane-dense path.
            fwd = jax.jit(functools.partial(ote_forward, num_elem=E,
                                            relayout_in_kernel=False))
            out = jax.block_until_ready(fwd(inputs, inputs_rel))
        ref = reference(inputs, inputs_rel, E)
        assert out.shape == inputs.shape
        assert jnp.allclose(out, ref, rtol=1e-5, atol=1e-5)

    key = jax.random.PRNGKey(0)
    keys = jax.random.split(key, 8)
    E = 4

    # 1) tiny: single grid step, padded tail groups (B = 128).
    a1 = jax.random.normal(keys[0], (2, 8, 32), dtype=jnp.float32)
    r1 = jax.random.normal(keys[1], (2, 8, 32 * E), dtype=jnp.float32)
    check(a1, r1, E)

    # 2) tiny, group count not a multiple of 128 (padded tail, B = 144).
    a2 = jax.random.normal(keys[2], (2, 8, 36), dtype=jnp.float32)
    r2 = jax.random.normal(keys[3], (2, 8, 36 * E), dtype=jnp.float32)
    check(a2, r2, E)

    # 3) multi-step grid (4 steps) with a masked partial last rel block.
    a3 = jax.random.normal(keys[4], (4, 63, 128), dtype=jnp.float32)
    r3 = jax.random.normal(keys[5], (4, 63, 128 * E), dtype=jnp.float32)
    check(a3, r3, E)

    # 4) num_elem whose square does not divide 128 -> lane-dense fallback.
    E2 = 3
    a4 = jax.random.normal(keys[6], (2, 8, 33), dtype=jnp.float32)
    r4 = jax.random.normal(keys[7], (2, 8, 33 * E2), dtype=jnp.float32)
    check(a4, r4, E2)

    print("KERNEL_OK")
</pallas_src>

<mosaic_0001>
module attributes {stable_mosaic.version = 11 : i64} {
  func.func @_ote_fused_kernel(%arg0: i32, %arg1: memref<1x32x128xf32, #tpu.memory_space<vmem>>, %arg2: memref<128x128xf32, #tpu.memory_space<vmem>>, %arg3: memref<1x32x128xf32, #tpu.memory_space<vmem>>) attributes {dimension_semantics = [#tpu.dimension_semantics<parallel>], iteration_bounds = array<i64: 1>, scalar_prefetch = 0 : i64, scratch_operands = 0 : i64, tpu.core_type = #tpu.core_type<tc>, window_params = [{transform_indices = @transform_0, window_bounds = array<i64: 1, 32, 128>}, {transform_indices = @transform_1, window_bounds = array<i64: 128, 128>}, {transform_indices = @transform_2, window_bounds = array<i64: 1, 32, 128>}]} {
    %c0_i32 = arith.constant 0 : i32
    %c1_i32 = arith.constant 1 : i32
    %0 = arith.muli %c0_i32, %c1_i32 : i32
    %c0_i32_0 = arith.constant 0 : i32
    %1 = arith.addi %c0_i32_0, %0 : i32
    %c128_i32 = arith.constant 128 : i32
    %2 = arith.muli %1, %c128_i32 : i32
    %3 = tpu.assume_multiple %2, 128 : i32
    %4 = arith.index_cast %3 : i32 to index
    %c0 = arith.constant 0 : index
    %5 = vector.load %arg2[%4, %c0] : memref<128x128xf32, #tpu.memory_space<vmem>>, vector<128x128xf32>
    %6 = tpu.transpose %5, [1, 0] : vector<128x128xf32> -> vector<128x128xf32>
    %7 = arith.index_cast %1 : i32 to index
    %c0_1 = arith.constant 0 : index
    %c0_2 = arith.constant 0 : index
    %8 = vector.load %arg1[%7, %c0_1, %c0_2] : memref<1x32x128xf32, #tpu.memory_space<vmem>>, vector<1x32x128xf32>
    %9 = vector.shape_cast %8 : vector<1x32x128xf32> to vector<32x128xf32>
    %10 = vector.extract_strided_slice %9 {offsets = [0, 0], sizes = [1, 128], strides = [1, 1]} : vector<32x128xf32> to vector<1x128xf32>
    %11 = vector.extract_strided_slice %6 {offsets = [0, 0], sizes = [4, 128], strides = [1, 1]} : vector<128x128xf32> to vector<4x128xf32>
    %12 = vector.broadcast %10 : vector<1x128xf32> to vector<4x128xf32>
    %13 = arith.mulf %12, %11 : vector<4x128xf32>
    %14 = vector.extract_strided_slice %9 {offsets = [1, 0], sizes = [1, 128], strides = [1, 1]} : vector<32x128xf32> to vector<1x128xf32>
    %15 = vector.extract_strided_slice %6 {offsets = [4, 0], sizes = [4, 128], strides = [1, 1]} : vector<128x128xf32> to vector<4x128xf32>
    %16 = vector.broadcast %14 : vector<1x128xf32> to vector<4x128xf32>
    %17 = arith.mulf %16, %15 : vector<4x128xf32>
    %18 = arith.addf %13, %17 : vector<4x128xf32>
    %19 = vector.extract_strided_slice %9 {offsets = [2, 0], sizes = [1, 128], strides = [1, 1]} : vector<32x128xf32> to vector<1x128xf32>
    %20 = vector.extract_strided_slice %6 {offsets = [8, 0], sizes = [4, 128], strides = [1, 1]} : vector<128x128xf32> to vector<4x128xf32>
    %21 = vector.broadcast %19 : vector<1x128xf32> to vector<4x128xf32>
    %22 = arith.mulf %21, %20 : vector<4x128xf32>
    %23 = arith.addf %18, %22 : vector<4x128xf32>
    %24 = vector.extract_strided_slice %9 {offsets = [3, 0], sizes = [1, 128], strides = [1, 1]} : vector<32x128xf32> to vector<1x128xf32>
    %25 = vector.extract_strided_slice %6 {offsets = [12, 0], sizes = [4, 128], strides = [1, 1]} : vector<128x128xf32> to vector<4x128xf32>
    %26 = vector.broadcast %24 : vector<1x128xf32> to vector<4x128xf32>
    %27 = arith.mulf %26, %25 : vector<4x128xf32>
    %28 = arith.addf %23, %27 : vector<4x128xf32>
    %29 = vector.extract_strided_slice %9 {offsets = [4, 0], sizes = [1, 128], strides = [1, 1]} : vector<32x128xf32> to vector<1x128xf32>
    %30 = vector.extract_strided_slice %6 {offsets = [16, 0], sizes = [4, 128], strides = [1, 1]} : vector<128x128xf32> to vector<4x128xf32>
    %31 = vector.broadcast %29 : vector<1x128xf32> to vector<4x128xf32>
    %32 = arith.mulf %31, %30 : vector<4x128xf32>
    %33 = vector.extract_strided_slice %9 {offsets = [5, 0], sizes = [1, 128], strides = [1, 1]} : vector<32x128xf32> to vector<1x128xf32>
    %34 = vector.extract_strided_slice %6 {offsets = [20, 0], sizes = [4, 128], strides = [1, 1]} : vector<128x128xf32> to vector<4x128xf32>
    %35 = vector.broadcast %33 : vector<1x128xf32> to vector<4x128xf32>
    %36 = arith.mulf %35, %34 : vector<4x128xf32>
    %37 = arith.addf %32, %36 : vector<4x128xf32>
    %38 = vector.extract_strided_slice %9 {offsets = [6, 0], sizes = [1, 128], strides = [1, 1]} : vector<32x128xf32> to vector<1x128xf32>
    %39 = vector.extract_strided_slice %6 {offsets = [24, 0], sizes = [4, 128], strides = [1, 1]} : vector<128x128xf32> to vector<4x128xf32>
    %40 = vector.broadcast %38 : vector<1x128xf32> to vector<4x128xf32>
    %41 = arith.mulf %40, %39 : vector<4x128xf32>
    %42 = arith.addf %37, %41 : vector<4x128xf32>
    %43 = vector.extract_strided_slice %9 {offsets = [7, 0], sizes = [1, 128], strides = [1, 1]} : vector<32x128xf32> to vector<1x128xf32>
    %44 = vector.extract_strided_slice %6 {offsets = [28, 0], sizes = [4, 128], strides = [1, 1]} : vector<128x128xf32> to vector<4x128xf32>
    %45 = vector.broadcast %43 : vector<1x128xf32> to vector<4x128xf32>
    %46 = arith.mulf %45, %44 : vector<4x128xf32>
    %47 = arith.addf %42, %46 : vector<4x128xf32>
    %48 = vector.extract_strided_slice %9 {offsets = [8, 0], sizes = [1, 128], strides = [1, 1]} : vector<32x128xf32> to vector<1x128xf32>
    %49 = vector.extract_strided_slice %6 {offsets = [32, 0], sizes = [4, 128], strides = [1, 1]} : vector<128x128xf32> to vector<4x128xf32>
    %50 = vector.broadcast %48 : vector<1x128xf32> to vector<4x128xf32>
    %51 = arith.mulf %50, %49 : vector<4x128xf32>
    %52 = vector.extract_strided_slice %9 {offsets = [9, 0], sizes = [1, 128], strides = [1, 1]} : vector<32x128xf32> to vector<1x128xf32>
    %53 = vector.extract_strided_slice %6 {offsets = [36, 0], sizes = [4, 128], strides = [1, 1]} : vector<128x128xf32> to vector<4x128xf32>
    %54 = vector.broadcast %52 : vector<1x128xf32> to vector<4x128xf32>
    %55 = arith.mulf %54, %53 : vector<4x128xf32>
    %56 = arith.addf %51, %55 : vector<4x128xf32>
    %57 = vector.extract_strided_slice %9 {offsets = [10, 0], sizes = [1, 128], strides = [1, 1]} : vector<32x128xf32> to vector<1x128xf32>
    %58 = vector.extract_strided_slice %6 {offsets = [40, 0], sizes = [4, 128], strides = [1, 1]} : vector<128x128xf32> to vector<4x128xf32>
    %59 = vector.broadcast %57 : vector<1x128xf32> to vector<4x128xf32>
    %60 = arith.mulf %59, %58 : vector<4x128xf32>
    %61 = arith.addf %56, %60 : vector<4x128xf32>
    %62 = vector.extract_strided_slice %9 {offsets = [11, 0], sizes = [1, 128], strides = [1, 1]} : vector<32x128xf32> to vector<1x128xf32>
    %63 = vector.extract_strided_slice %6 {offsets = [44, 0], sizes = [4, 128], strides = [1, 1]} : vector<128x128xf32> to vector<4x128xf32>
    %64 = vector.broadcast %62 : vector<1x128xf32> to vector<4x128xf32>
    %65 = arith.mulf %64, %63 : vector<4x128xf32>
    %66 = arith.addf %61, %65 : vector<4x128xf32>
    %67 = vector.extract_strided_slice %9 {offsets = [12, 0], sizes = [1, 128], strides = [1, 1]} : vector<32x128xf32> to vector<1x128xf32>
    %68 = vector.extract_strided_slice %6 {offsets = [48, 0], sizes = [4, 128], strides = [1, 1]} : vector<128x128xf32> to vector<4x128xf32>
    %69 = vector.broadcast %67 : vector<1x128xf32> to vector<4x128xf32>
    %70 = arith.mulf %69, %68 : vector<4x128xf32>
    %71 = vector.extract_strided_slice %9 {offsets = [13, 0], sizes = [1, 128], strides = [1, 1]} : vector<32x128xf32> to vector<1x128xf32>
    %72 = vector.extract_strided_slice %6 {offsets = [52, 0], sizes = [4, 128], strides = [1, 1]} : vector<128x128xf32> to vector<4x128xf32>
    %73 = vector.broadcast %71 : vector<1x128xf32> to vector<4x128xf32>
    %74 = arith.mulf %73, %72 : vector<4x128xf32>
    %75 = arith.addf %70, %74 : vector<4x128xf32>
    %76 = vector.extract_strided_slice %9 {offsets = [14, 0], sizes = [1, 128], strides = [1, 1]} : vector<32x128xf32> to vector<1x128xf32>
    %77 = vector.extract_strided_slice %6 {offsets = [56, 0], sizes = [4, 128], strides = [1, 1]} : vector<128x128xf32> to vector<4x128xf32>
    %78 = vector.broadcast %76 : vector<1x128xf32> to vector<4x128xf32>
    %79 = arith.mulf %78, %77 : vector<4x128xf32>
    %80 = arith.addf %75, %79 : vector<4x128xf32>
    %81 = vector.extract_strided_slice %9 {offsets = [15, 0], sizes = [1, 128], strides = [1, 1]} : vector<32x128xf32> to vector<1x128xf32>
    %82 = vector.extract_strided_slice %6 {offsets = [60, 0], sizes = [4, 128], strides = [1, 1]} : vector<128x128xf32> to vector<4x128xf32>
    %83 = vector.broadcast %81 : vector<1x128xf32> to vector<4x128xf32>
    %84 = arith.mulf %83, %82 : vector<4x128xf32>
    %85 = arith.addf %80, %84 : vector<4x128xf32>
    %86 = vector.extract_strided_slice %9 {offsets = [16, 0], sizes = [1, 128], strides = [1, 1]} : vector<32x128xf32> to vector<1x128xf32>
    %87 = vector.extract_strided_slice %6 {offsets = [64, 0], sizes = [4, 128], strides = [1, 1]} : vector<128x128xf32> to vector<4x128xf32>
    %88 = vector.broadcast %86 : vector<1x128xf32> to vector<4x128xf32>
    %89 = arith.mulf %88, %87 : vector<4x128xf32>
    %90 = vector.extract_strided_slice %9 {offsets = [17, 0], sizes = [1, 128], strides = [1, 1]} : vector<32x128xf32> to vector<1x128xf32>
    %91 = vector.extract_strided_slice %6 {offsets = [68, 0], sizes = [4, 128], strides = [1, 1]} : vector<128x128xf32> to vector<4x128xf32>
    %92 = vector.broadcast %90 : vector<1x128xf32> to vector<4x128xf32>
    %93 = arith.mulf %92, %91 : vector<4x128xf32>
    %94 = arith.addf %89, %93 : vector<4x128xf32>
    %95 = vector.extract_strided_slice %9 {offsets = [18, 0], sizes = [1, 128], strides = [1, 1]} : vector<32x128xf32> to vector<1x128xf32>
    %96 = vector.extract_strided_slice %6 {offsets = [72, 0], sizes = [4, 128], strides = [1, 1]} : vector<128x128xf32> to vector<4x128xf32>
    %97 = vector.broadcast %95 : vector<1x128xf32> to vector<4x128xf32>
    %98 = arith.mulf %97, %96 : vector<4x128xf32>
    %99 = arith.addf %94, %98 : vector<4x128xf32>
    %100 = vector.extract_strided_slice %9 {offsets = [19, 0], sizes = [1, 128], strides = [1, 1]} : vector<32x128xf32> to vector<1x128xf32>
    %101 = vector.extract_strided_slice %6 {offsets = [76, 0], sizes = [4, 128], strides = [1, 1]} : vector<128x128xf32> to vector<4x128xf32>
    %102 = vector.broadcast %100 : vector<1x128xf32> to vector<4x128xf32>
    %103 = arith.mulf %102, %101 : vector<4x128xf32>
    %104 = arith.addf %99, %103 : vector<4x128xf32>
    %105 = vector.extract_strided_slice %9 {offsets = [20, 0], sizes = [1, 128], strides = [1, 1]} : vector<32x128xf32> to vector<1x128xf32>
    %106 = vector.extract_strided_slice %6 {offsets = [80, 0], sizes = [4, 128], strides = [1, 1]} : vector<128x128xf32> to vector<4x128xf32>
    %107 = vector.broadcast %105 : vector<1x128xf32> to vector<4x128xf32>
    %108 = arith.mulf %107, %106 : vector<4x128xf32>
    %109 = vector.extract_strided_slice %9 {offsets = [21, 0], sizes = [1, 128], strides = [1, 1]} : vector<32x128xf32> to vector<1x128xf32>
    %110 = vector.extract_strided_slice %6 {offsets = [84, 0], sizes = [4, 128], strides = [1, 1]} : vector<128x128xf32> to vector<4x128xf32>
    %111 = vector.broadcast %109 : vector<1x128xf32> to vector<4x128xf32>
    %112 = arith.mulf %111, %110 : vector<4x128xf32>
    %113 = arith.addf %108, %112 : vector<4x128xf32>
    %114 = vector.extract_strided_slice %9 {offsets = [22, 0], sizes = [1, 128], strides = [1, 1]} : vector<32x128xf32> to vector<1x128xf32>
    %115 = vector.extract_strided_slice %6 {offsets = [88, 0], sizes = [4, 128], strides = [1, 1]} : vector<128x128xf32> to vector<4x128xf32>
    %116 = vector.broadcast %114 : vector<1x128xf32> to vector<4x128xf32>
    %117 = arith.mulf %116, %115 : vector<4x128xf32>
    %118 = arith.addf %113, %117 : vector<4x128xf32>
    %119 = vector.extract_strided_slice %9 {offsets = [23, 0], sizes = [1, 128], strides = [1, 1]} : vector<32x128xf32> to vector<1x128xf32>
    %120 = vector.extract_strided_slice %6 {offsets = [92, 0], sizes = [4, 128], strides = [1, 1]} : vector<128x128xf32> to vector<4x128xf32>
    %121 = vector.broadcast %119 : vector<1x128xf32> to vector<4x128xf32>
    %122 = arith.mulf %121, %120 : vector<4x128xf32>
    %123 = arith.addf %118, %122 : vector<4x128xf32>
    %124 = vector.extract_strided_slice %9 {offsets = [24, 0], sizes = [1, 128], strides = [1, 1]} : vector<32x128xf32> to vector<1x128xf32>
    %125 = vector.extract_strided_slice %6 {offsets = [96, 0], sizes = [4, 128], strides = [1, 1]} : vector<128x128xf32> to vector<4x128xf32>
    %126 = vector.broadcast %124 : vector<1x128xf32> to vector<4x128xf32>
    %127 = arith.mulf %126, %125 : vector<4x128xf32>
    %128 = vector.extract_strided_slice %9 {offsets = [25, 0], sizes = [1, 128], strides = [1, 1]} : vector<32x128xf32> to vector<1x128xf32>
    %129 = vector.extract_strided_slice %6 {offsets = [100, 0], sizes = [4, 128], strides = [1, 1]} : vector<128x128xf32> to vector<4x128xf32>
    %130 = vector.broadcast %128 : vector<1x128xf32> to vector<4x128xf32>
    %131 = arith.mulf %130, %129 : vector<4x128xf32>
    %132 = arith.addf %127, %131 : vector<4x128xf32>
    %133 = vector.extract_strided_slice %9 {offsets = [26, 0], sizes = [1, 128], strides = [1, 1]} : vector<32x128xf32> to vector<1x128xf32>
    %134 = vector.extract_strided_slice %6 {offsets = [104, 0], sizes = [4, 128], strides = [1, 1]} : vector<128x128xf32> to vector<4x128xf32>
    %135 = vector.broadcast %133 : vector<1x128xf32> to vector<4x128xf32>
    %136 = arith.mulf %135, %134 : vector<4x128xf32>
    %137 = arith.addf %132, %136 : vector<4x128xf32>
    %138 = vector.extract_strided_slice %9 {offsets = [27, 0], sizes = [1, 128], strides = [1, 1]} : vector<32x128xf32> to vector<1x128xf32>
    %139 = vector.extract_strided_slice %6 {offsets = [108, 0], sizes = [4, 128], strides = [1, 1]} : vector<128x128xf32> to vector<4x128xf32>
    %140 = vector.broadcast %138 : vector<1x128xf32> to vector<4x128xf32>
    %141 = arith.mulf %140, %139 : vector<4x128xf32>
    %142 = arith.addf %137, %141 : vector<4x128xf32>
    %143 = vector.extract_strided_slice %9 {offsets = [28, 0], sizes = [1, 128], strides = [1, 1]} : vector<32x128xf32> to vector<1x128xf32>
    %144 = vector.extract_strided_slice %6 {offsets = [112, 0], sizes = [4, 128], strides = [1, 1]} : vector<128x128xf32> to vector<4x128xf32>
    %145 = vector.broadcast %143 : vector<1x128xf32> to vector<4x128xf32>
    %146 = arith.mulf %145, %144 : vector<4x128xf32>
    %147 = vector.extract_strided_slice %9 {offsets = [29, 0], sizes = [1, 128], strides = [1, 1]} : vector<32x128xf32> to vector<1x128xf32>
    %148 = vector.extract_strided_slice %6 {offsets = [116, 0], sizes = [4, 128], strides = [1, 1]} : vector<128x128xf32> to vector<4x128xf32>
    %149 = vector.broadcast %147 : vector<1x128xf32> to vector<4x128xf32>
    %150 = arith.mulf %149, %148 : vector<4x128xf32>
    %151 = arith.addf %146, %150 : vector<4x128xf32>
    %152 = vector.extract_strided_slice %9 {offsets = [30, 0], sizes = [1, 128], strides = [1, 1]} : vector<32x128xf32> to vector<1x128xf32>
    %153 = vector.extract_strided_slice %6 {offsets = [120, 0], sizes = [4, 128], strides = [1, 1]} : vector<128x128xf32> to vector<4x128xf32>
    %154 = vector.broadcast %152 : vector<1x128xf32> to vector<4x128xf32>
    %155 = arith.mulf %154, %153 : vector<4x128xf32>
    %156 = arith.addf %151, %155 : vector<4x128xf32>
    %157 = vector.extract_strided_slice %9 {offsets = [31, 0], sizes = [1, 128], strides = [1, 1]} : vector<32x128xf32> to vector<1x128xf32>
    %158 = vector.extract_strided_slice %6 {offsets = [124, 0], sizes = [4, 128], strides = [1, 1]} : vector<128x128xf32> to vector<4x128xf32>
    %159 = vector.broadcast %157 : vector<1x128xf32> to vector<4x128xf32>
    %160 = arith.mulf %159, %158 : vector<4x128xf32>
    %161 = arith.addf %156, %160 : vector<4x128xf32>
    %162 = tpu.concatenate %28, %47, %66, %85, %104, %123, %142, %161 in 0 : vector<4x128xf32>, vector<4x128xf32>, vector<4x128xf32>, vector<4x128xf32>, vector<4x128xf32>, vector<4x128xf32>, vector<4x128xf32>, vector<4x128xf32> -> vector<32x128xf32>
    %163 = arith.index_cast %1 : i32 to index
    %c0_3 = arith.constant 0 : index
    %c0_4 = arith.constant 0 : index
    %164 = vector.load %arg3[%163, %c0_3, %c0_4] : memref<1x32x128xf32, #tpu.memory_space<vmem>>, vector<1x32x128xf32>
    %165 = vector.shape_cast %164 : vector<1x32x128xf32> to vector<32x128xf32>
    %166 = vector.shape_cast %162 : vector<32x128xf32> to vector<1x32x128xf32>
    tpu.vector_store %arg3[%163, %c0_3, %c0_4], %166 {strides = array<i32>} : memref<1x32x128xf32, #tpu.memory_space<vmem>>, vector<1x32x128xf32>,
    %c1_i32_5 = arith.constant 1 : i32
    return
  }
  func.func @transform_0(%arg0: i32) -> (i32, i32, i32) {
    %c0_i32 = arith.constant 0 : i32
    %c0_i32_0 = arith.constant 0 : i32
    %c0_i32_1 = arith.constant 0 : i32
    return %arg0, %c0_i32, %c0_i32_0 : i32, i32, i32
  }
  func.func @transform_1(%arg0: i32) -> (i32, i32) {
    %c0_i32 = arith.constant 0 : i32
    %c0_i32_0 = arith.constant 0 : i32
    return %arg0, %c0_i32 : i32, i32
  }
  func.func @transform_2(%arg0: i32) -> (i32, i32, i32) {
    %c0_i32 = arith.constant 0 : i32
    %c0_i32_0 = arith.constant 0 : i32
    %c0_i32_1 = arith.constant 0 : i32
    return %arg0, %c0_i32, %c0_i32_0 : i32, i32, i32
  }
}

module attributes {stable_mosaic.version = 11 : i64} {
  func.func @_ote_fallback_kernel(%arg0: i32, %arg1: memref<4x128xf32, #tpu.memory_space<vmem>>, %arg2: memref<16x128xf32, #tpu.memory_space<vmem>>, %arg3: memref<4x128xf32, #tpu.memory_space<vmem>>) attributes {dimension_semantics = [#tpu.dimension_semantics<parallel>], iteration_bounds = array<i64: 1>, scalar_prefetch = 0 : i64, scratch_operands = 0 : i64, tpu.core_type = #tpu.core_type<tc>, window_params = [{transform_indices = @transform_0, window_bounds = array<i64: 4, 128>}, {transform_indices = @transform_1, window_bounds = array<i64: 16, 128>}, {transform_indices = @transform_2, window_bounds = array<i64: 4, 128>}]} {
    %c0 = arith.constant 0 : index
    %c0_0 = arith.constant 0 : index
    %0 = vector.load %arg1[%c0, %c0_0] : memref<4x128xf32, #tpu.memory_space<vmem>>, vector<1x128xf32>
    %c0_1 = arith.constant 0 : index
    %c0_2 = arith.constant 0 : index
    %1 = vector.load %arg2[%c0_1, %c0_2] : memref<16x128xf32, #tpu.memory_space<vmem>>, vector<4x128xf32>
    %2 = vector.broadcast %0 : vector<1x128xf32> to vector<4x128xf32>
    %3 = arith.mulf %2, %1 : vector<4x128xf32>
    %c1 = arith.constant 1 : index
    %c0_3 = arith.constant 0 : index
    %4 = vector.load %arg1[%c1, %c0_3] : memref<4x128xf32, #tpu.memory_space<vmem>>, vector<1x128xf32>
    %c4 = arith.constant 4 : index
    %c0_4 = arith.constant 0 : index
    %5 = vector.load %arg2[%c4, %c0_4] : memref<16x128xf32, #tpu.memory_space<vmem>>, vector<4x128xf32>
    %6 = vector.broadcast %4 : vector<1x128xf32> to vector<4x128xf32>
    %7 = arith.mulf %6, %5 : vector<4x128xf32>
    %8 = arith.addf %3, %7 : vector<4x128xf32>
    %c2 = arith.constant 2 : index
    %c0_5 = arith.constant 0 : index
    %9 = vector.load %arg1[%c2, %c0_5] : memref<4x128xf32, #tpu.memory_space<vmem>>, vector<1x128xf32>
    %c8 = arith.constant 8 : index
    %c0_6 = arith.constant 0 : index
    %10 = vector.load %arg2[%c8, %c0_6] : memref<16x128xf32, #tpu.memory_space<vmem>>, vector<4x128xf32>
    %11 = vector.broadcast %9 : vector<1x128xf32> to vector<4x128xf32>
    %12 = arith.mulf %11, %10 : vector<4x128xf32>
    %13 = arith.addf %8, %12 : vector<4x128xf32>
    %c3 = arith.constant 3 : index
    %c0_7 = arith.constant 0 : index
    %14 = vector.load %arg1[%c3, %c0_7] : memref<4x128xf32, #tpu.memory_space<vmem>>, vector<1x128xf32>
    %c12 = arith.constant 12 : index
    %c0_8 = arith.constant 0 : index
    %15 = vector.load %arg2[%c12, %c0_8] : memref<16x128xf32, #tpu.memory_space<vmem>>, vector<4x128xf32>
    %16 = vector.broadcast %14 : vector<1x128xf32> to vector<4x128xf32>
    %17 = arith.mulf %16, %15 : vector<4x128xf32>
    %18 = arith.addf %13, %17 : vector<4x128xf32>
    %c0_9 = arith.constant 0 : index
    %c0_10 = arith.constant 0 : index
    %19 = vector.load %arg3[%c0_9, %c0_10] : memref<4x128xf32, #tpu.memory_space<vmem>>, vector<4x128xf32>
    tpu.vector_store %arg3[%c0_9, %c0_10], %18 {strides = array<i32>} : memref<4x128xf32, #tpu.memory_space<vmem>>, vector<4x128xf32>,
    return
  }
  func.func @transform_0(%arg0: i32) -> (i32, i32) {
    %c0_i32 = arith.constant 0 : i32
    %c0_i32_0 = arith.constant 0 : i32
    return %c0_i32, %arg0 : i32, i32
  }
  func.func @transform_1(%arg0: i32) -> (i32, i32) {
    %c0_i32 = arith.constant 0 : i32
    %c0_i32_0 = arith.constant 0 : i32
    return %c0_i32, %arg0 : i32, i32
  }
  func.func @transform_2(%arg0: i32) -> (i32, i32) {
    %c0_i32 = arith.constant 0 : i32
    %c0_i32_0 = arith.constant 0 : i32
    return %c0_i32, %arg0 : i32, i32
  }
}

</mosaic_0001>

<bundles_post_ra>
// kernel: ote_forward.1
= control target key start
LH: loop header
LB: loop body
LE: loop exit
PB: predicated region body
PF: predicated region fallthrough
CT: control target
= control target key end

     0   :  { %v63_v16 = vlaneseq  ;;  %vm307_vm0 = vcmask 1043456   ;;  %s459_s1 = inlined_call_operand.vmem [shape: f32[128,128], index: 1, kind: input, shape index: {}]   ;;  %s460_s0 = inlined_call_operand.vmem [shape: f32[1,32,128], index: 0, kind: input, shape index: {}]   ;;  %s461_s2 = inlined_call_operand.vmem [shape: f32[1,32,128], index: 2, kind: output, shape index: {}]  }
   0x1   :  { %v11_v0 = vld [vmem:[%s459_s1] sm:$0xff]  ;;  %v12_v1 = vld [vmem:[%s459_s1 + $0x8] sm:$0xff]  ;;  %v13_v2 = vld [vmem:[%s459_s1 + $0x10] sm:$0xff] }
   0x2   :  { %27 = vxpose.xlu0.b32.start [1/16] %v11_v0, 128  ;;  %v14_v3 = vld [vmem:[%s459_s1 + $0x18] sm:$0xff]  ;;  %v15_v4 = vld [vmem:[%s459_s1 + $0x20] sm:$0xff]  ;;  %v16_v5 = vld [vmem:[%s459_s1 + $0x28] sm:$0xff]  ;;  %v64_v17 = vshrl.u32 %v63_v16, 7 }
   0x3   :  { %v17_v6 = vld [vmem:[%s459_s1 + $0x30] sm:$0xff]  ;;  %v18_v7 = vld [vmem:[%s459_s1 + $0x38] sm:$0xff]  ;;  %v19_v8 = vld [vmem:[%s459_s1 + $0x40] sm:$0xff] }
   0x4   :  { %v20_v9 = vld [vmem:[%s459_s1 + $0x48] sm:$0xff]  ;;  %v21_v10 = vld [vmem:[%s459_s1 + $0x50] sm:$0xff]  ;;  %v22_v11 = vld [vmem:[%s459_s1 + $0x58] sm:$0xff]  ;;  %v383_v18 = vsub.s32 1, %v64_v17  ;;  %v389_v22 = vsub.s32 0, %v64_v17  ;;  %v391_v23 = vsub.s32 5, %v64_v17 }
   0x5   :  { %v23_v12 = vld [vmem:[%s459_s1 + $0x60] sm:$0xff]  ;;  %v24_v13 = vld [vmem:[%s459_s1 + $0x68] sm:$0xff]  ;;  %v25_v14 = vld [vmem:[%s459_s1 + $0x70] sm:$0xff]  ;;  %v393_v25 = vsub.s32 2, %v64_v17  ;;  %v395_v26 = vsub.s32 3, %v64_v17  ;;  %v397_v27 = vsub.s32 4, %v64_v17 }
   0x6   :  { %28 = vxpose.xlu0.b32.cont [2/16] %v12_v1, 128  ;;  %v26_v15 = vld [vmem:[%s459_s1 + $0x78] sm:$0xff]  ;;  %v59_v19 = vld [vmem:[%s460_s0] sm:$0xff]  ;;  %v401_v31 = vsub.s32 6, %v64_v17  ;;  %v403_v32 = vsub.s32 7, %v64_v17  ;;  %v60_v47 = vld [vmem:[%s460_s0 + $0x8] sm:$0xff] }
   0x7   :  { %v71_v20 = vrot.slane %v59_v19, %v383_v18  ;;  %v66_v28 = vrot.slane %v59_v19, %v389_v22  ;;  %v100_v30 = vrot.slane %v59_v19, %v391_v23  ;;  %v80_v34 = vrot.slane %v59_v19, %v393_v25  ;;  %v61_v16 = vld [vmem:[%s460_s0 + $0x10] sm:$0xff] }
   0x8   :  { %v86_v35 = vrot.slane %v59_v19, %v395_v26  ;;  %v95_v36 = vrot.slane %v59_v19, %v397_v27  ;;  %v109_v40 = vrot.slane %v59_v19, %v401_v31  ;;  %v115_v41 = vrot.slane %v59_v19, %v403_v32 }
   0x9   :  { %v129_v52 = vrot.slane %v60_v47, %v383_v18  ;;  %v124_v62 = vrot.slane %v60_v47, %v389_v22  ;;  %v158_v1 = vrot.slane %v60_v47, %v391_v23 }
   0xa   :  { %29 = vxpose.xlu0.b32.cont [3/16] %v13_v2, 128 }
   0xe   :  { %30 = vxpose.xlu0.b32.cont [4/16] %v14_v3, 128  ;;  %v138_v3 = vrot.slane %v60_v47, %v393_v25 }
  0x12   :  { %31 = vxpose.xlu0.b32.cont [5/16] %v15_v4, 128  ;;  %v144_v4 = vrot.slane %v60_v47, %v395_v26 }
  0x16   :  { %32 = vxpose.xlu0.b32.cont [6/16] %v16_v5, 128  ;;  %v153_v5 = vrot.slane %v60_v47, %v397_v27 }
  0x1a   :  { %33 = vxpose.xlu0.b32.cont [7/16] %v17_v6, 128 }
  0x1e   :  { %34 = vxpose.xlu0.b32.cont [8/16] %v18_v7, 128 }
  0x22   :  { %35 = vxpose.xlu0.b32.cont [9/16] %v19_v8, 128 }
  0x26   :  { %36 = vxpose.xlu0.b32.cont [10/16] %v20_v9, 128  ;;  %v167_v9 = vrot.slane %v60_v47, %v401_v31 }
  0x2a   :  { %37 = vxpose.xlu0.b32.cont [11/16] %v21_v10, 128  ;;  %v173_v10 = vrot.slane %v60_v47, %v403_v32 }
  0x2e   :  { %38 = vxpose.xlu0.b32.cont [12/16] %v22_v11, 128 }
  0x32   :  { %39 = vxpose.xlu0.b32.cont [13/16] %v23_v12, 128 }
  0x36   :  { %40 = vxpose.xlu0.b32.cont [14/16] %v24_v13, 128 }
  0x3a   :  { %41 = vxpose.xlu0.b32.cont [15/16] %v25_v14, 128 }
  0x3e   :  { %42 = vxpose.xlu0.b32.end [16/16] %v26_v15, 128 }
  0x82   :  { %v43_v21 = vpop.trf.xlu0 }
  0x83   :  { %v72_v24 = vmul.f32 %v71_v20, %v43_v21  ;;  %v67_v37 = vmul.f32 %v66_v28, %v43_v21 }
  0x85   :  { %v74_v33 = vrot.slane %v72_v24, 4  ;;  %v187_v24 = vrot.slane %v61_v16, %v383_v18 }
  0x86   :  { %v44_v29 = vpop.trf.xlu0 }
  0x87   :  { %v76_v42 = vadd.f32 %v74_v33, %v67_v37  ;;  %v81_v43 = vmul.f32 %v80_v34, %v44_v29  ;;  %v87_v44 = vmul.f32 %v86_v35, %v44_v29 }
  0x89   :  { %v82_v53 = vadd.f32 %v81_v43, %v76_v42  ;;  %v89_v54 = vrot.slane %v87_v44, 4  ;;  %v216_v42 = vrot.slane %v61_v16, %v391_v23  ;;  %v196_v44 = vrot.slane %v61_v16, %v393_v25 }
  0x8a   :  { %v45_v38 = vpop.trf.xlu0 }
  0x8b   :  { %v101_v39 = vmul.f32 %v100_v30, %v45_v38  ;;  %v96_v45 = vmul.f32 %v95_v36, %v45_v38  ;;  %v91_v60 = vadd.f32 %v89_v54, %v82_v53 }
  0x8d   :  { %v103_v46 = vrot.slane %v101_v39, 4  ;;  %v182_v39 = vrot.slane %v61_v16, %v389_v22 }
  0x8e   :  { %v46_v48 = vpop.trf.xlu0 }
  0x8f   :  { %v105_v49 = vadd.f32 %v103_v46, %v96_v45  ;;  %v110_v50 = vmul.f32 %v109_v40, %v46_v48  ;;  %v116_v51 = vmul.f32 %v115_v41, %v46_v48  ;;  %v202_v45 = vrot.slane %v61_v16, %v395_v26 }
  0x90   :  { %v211_v46 = vrot.slane %v61_v16, %v397_v27 }
  0x91   :  { %v111_v55 = vadd.f32 %v110_v50, %v105_v49  ;;  %v118_v56 = vrot.slane %v116_v51, 4  ;;  %v225_v50 = vrot.slane %v61_v16, %v401_v31  ;;  %v231_v51 = vrot.slane %v61_v16, %v403_v32 }
  0x92   :  { %v47_v57 = vpop.trf.xlu0 }
  0x93   :  { %v120_v58 = vadd.f32 %v118_v56, %v111_v55  ;;  %v130_v59 = vmul.f32 %v129_v52, %v47_v57  ;;  %v125_v6 = vmul.f32 %v124_v62, %v47_v57  ;;  %v62_v57 = vld [vmem:[%s460_s0 + $0x18] sm:$0xff] }
  0x94   :  { %v245_v62 = vrot.slane %v62_v57, %v383_v18 }
  0x95   :  { %v296_v61 = vrot.slane %v120_v58, 4  ;;  %v132_v2 = vrot.slane %v130_v59, 4 }
  0x96   :  { %v48_v63 = vpop.trf.xlu0 }
  0x97   :  { %v308_v0 = vsel %vm307_vm0, %v91_v60, %v296_v61  ;;  %v134_v11 = vadd.f32 %v132_v2, %v125_v6  ;;  %v139_v12 = vmul.f32 %v138_v3, %v48_v63  ;;  %v145_v13 = vmul.f32 %v144_v4, %v48_v63 }
  0x98   :  { %312 = vst [vmem:[%s461_s2] sm:$0xff] %v308_v0 }
  0x99   :  { %v140_v28 = vadd.f32 %v139_v12, %v134_v11  ;;  %v147_v29 = vrot.slane %v145_v13, 4  ;;  %v274_v11 = vrot.slane %v62_v57, %v391_v23  ;;  %v254_v12 = vrot.slane %v62_v57, %v393_v25 }
  0x9a   :  { %v49_v7 = vpop.trf.xlu0  ;;  %v260_v13 = vrot.slane %v62_v57, %v395_v26 }
  0x9b   :  { %v159_v8 = vmul.f32 %v158_v1, %v49_v7  ;;  %v154_v14 = vmul.f32 %v153_v5, %v49_v7  ;;  %v149_v37 = vadd.f32 %v147_v29, %v140_v28 }
  0x9d   :  { %v161_v15 = vrot.slane %v159_v8, 4  ;;  %v240_v8 = vrot.slane %v62_v57, %v389_v22  ;;  %v283_v22 = vrot.slane %v62_v57, %v401_v31 }
  0x9e   :  { %v50_v17 = vpop.trf.xlu0 }
  0x9f   :  { %v163_v19 = vadd.f32 %v161_v15, %v154_v14  ;;  %v168_v20 = vmul.f32 %v167_v9, %v50_v17  ;;  %v174_v21 = vmul.f32 %v173_v10, %v50_v17  ;;  %v269_v14 = vrot.slane %v62_v57, %v397_v27 }
  0xa1   :  { %v169_v30 = vadd.f32 %v168_v20, %v163_v19  ;;  %v176_v33 = vrot.slane %v174_v21, 4  ;;  %v289_v19 = vrot.slane %v62_v57, %v403_v32 }
  0xa2   :  { %v51_v34 = vpop.trf.xlu0 }
  0xa3   :  { %v178_v35 = vadd.f32 %v176_v33, %v169_v30  ;;  %v188_v36 = vmul.f32 %v187_v24, %v51_v34  ;;  %v183_v47 = vmul.f32 %v182_v39, %v51_v34 }
  0xa5   :  { %v299_v38 = vrot.slane %v178_v35, 4  ;;  %v190_v43 = vrot.slane %v188_v36, 4 }
  0xa6   :  { %v52_v40 = vpop.trf.xlu0 }
  0xa7   :  { %v309_v41 = vsel %vm307_vm0, %v149_v37, %v299_v38  ;;  %v192_v52 = vadd.f32 %v190_v43, %v183_v47  ;;  %v197_v53 = vmul.f32 %v196_v44, %v52_v40  ;;  %v203_v54 = vmul.f32 %v202_v45, %v52_v40 }
  0xa8   :  { %313 = vst [vmem:[%s461_s2 + $0x8] sm:$0xff] %v309_v41 }
  0xa9   :  { %v198_v63 = vadd.f32 %v197_v53, %v192_v52  ;;  %v205_v0 = vrot.slane %v203_v54, 4 }
  0xaa   :  { %v53_v48 = vpop.trf.xlu0 }
  0xab   :  { %v217_v49 = vmul.f32 %v216_v42, %v53_v48  ;;  %v212_v55 = vmul.f32 %v211_v46, %v53_v48  ;;  %v207_v6 = vadd.f32 %v205_v0, %v198_v63 }
  0xad   :  { %v219_v56 = vrot.slane %v217_v49, 4 }
  0xae   :  { %v54_v58 = vpop.trf.xlu0 }
  0xaf   :  { %v221_v59 = vadd.f32 %v219_v56, %v212_v55  ;;  %v226_v60 = vmul.f32 %v225_v50, %v54_v58  ;;  %v232_v61 = vmul.f32 %v231_v51, %v54_v58 }
  0xb1   :  { %v227_v1 = vadd.f32 %v226_v60, %v221_v59  ;;  %v234_v2 = vrot.slane %v232_v61, 4 }
  0xb2   :  { %v55_v3 = vpop.trf.xlu0 }
  0xb3   :  { %v236_v4 = vadd.f32 %v234_v2, %v227_v1  ;;  %v246_v5 = vmul.f32 %v245_v62, %v55_v3  ;;  %v241_v15 = vmul.f32 %v240_v8, %v55_v3 }
  0xb5   :  { %v302_v7 = vrot.slane %v236_v4, 4  ;;  %v248_v18 = vrot.slane %v246_v5, 4 }
  0xb6   :  { %v56_v9 = vpop.trf.xlu0 }
  0xb7   :  { %v310_v10 = vsel %vm307_vm0, %v207_v6, %v302_v7  ;;  %v250_v20 = vadd.f32 %v248_v18, %v241_v15  ;;  %v255_v23 = vmul.f32 %v254_v12, %v56_v9  ;;  %v261_v21 = vmul.f32 %v260_v13, %v56_v9 }
  0xb8   :  { %314 = vst [vmem:[%s461_s2 + $0x10] sm:$0xff] %v310_v10 }
  0xb9   :  { %v256_v34 = vadd.f32 %v255_v23, %v250_v20  ;;  %v263_v26 = vrot.slane %v261_v21, 4 }
  0xba   :  { %v57_v16 = vpop.trf.xlu0 }
  0xbb   :  { %v275_v17 = vmul.f32 %v274_v11, %v57_v16  ;;  %v270_v24 = vmul.f32 %v269_v14, %v57_v16  ;;  %v265_v37 = vadd.f32 %v263_v26, %v256_v34 }
  0xbd   :  { %v277_v28 = vrot.slane %v275_v17, 4 }
  0xbe   :  { %v58_v29 = vpop.trf.xlu0 }
  0xbf   :  { %v279_v30 = vadd.f32 %v277_v28, %v270_v24  ;;  %v284_v33 = vmul.f32 %v283_v22, %v58_v29  ;;  %v290_v25 = vmul.f32 %v289_v19, %v58_v29 }
  0xc1   :  { %v285_v35 = vadd.f32 %v284_v33, %v279_v30  ;;  %v292_v27 = vrot.slane %v290_v25, 4 }
  0xc3   :  { %v294_v36 = vadd.f32 %v292_v27, %v285_v35 }
  0xc5   :  { %v305_v38 = vrot.slane %v294_v36, 4 }
  0xc7   :  { %v311_v31 = vsel %vm307_vm0, %v265_v37, %v305_v38 }
  0xc8   :  { %315 = vst [vmem:[%s461_s2 + $0x18] sm:$0xff] %v311_v31 }

// kernel: ote_forward.1
= control target key start
LH: loop header
LB: loop body
LE: loop exit
PB: predicated region body
PF: predicated region fallthrough
CT: control target
= control target key end

     0   :  { %s93_s0 = inlined_call_operand.vmem [shape: f32[4,128], index: 0, kind: input, shape index: {}]   ;;  %s94_s1 = inlined_call_operand.vmem [shape: f32[16,128], index: 1, kind: input, shape index: {}]   ;;  %s95_s2 = inlined_call_operand.vmem [shape: f32[4,128], index: 2, kind: output, shape index: {}]  }
   0x1   :  { %v47_v0 = vld [vmem:[%s93_s0] ss:$0 sm:$0xff]  ;;  %v48_v2 = vld [vmem:[%s93_s0 + $0x1] ss:$0 sm:$0xff]  ;;  %v19_v4 = vld [vmem:[%s94_s1 + $0x4] sm:$0xf] }
   0x2   :  { %v12_v1 = vld [vmem:[%s94_s1] sm:$0xf]  ;;  %v27_v6 = vld [vmem:[%s94_s1 + $0x8] sm:$0xf]  ;;  %v24_v7 = vmul.f32 %v48_v2, %v19_v4  ;;  %v35_v10 = vld [vmem:[%s94_s1 + $0xc] sm:$0xf] }
   0x3   :  { %v17_v3 = vmul.f32 %v47_v0, %v12_v1  ;;  %v49_v5 = vld [vmem:[%s93_s0 + $0x2] ss:$0 sm:$0xff]  ;;  %v50_v9 = vld [vmem:[%s93_s0 + $0x3] ss:$0 sm:$0xff] }
   0x4   :  { %v32_v8 = vmul.f32 %v49_v5, %v27_v6  ;;  %v40_v12 = vmul.f32 %v50_v9, %v35_v10 }
   0x5   :  { %v25_v11 = vadd.f32 %v24_v7, %v17_v3 }
   0x7   :  { %v33_v13 = vadd.f32 %v32_v8, %v25_v11 }
   0x9   :  { %v41_v14 = vadd.f32 %v40_v12, %v33_v13 }
   0xb   :  { %42 = vst [vmem:[%s95_s2] sm:$0xf] %v41_v14 }

</bundles_post_ra>
